<compile_context>
chip_gen: v7x
topology: tpu7x:2x2x1
jax: 0.10.0
libtpu: 0.0.40
codegen_flags: <defaults>
</compile_context>

<pallas_src>
import functools

import jax
import jax.numpy as jnp
from jax import lax
from jax.experimental import pallas as pl
from jax.experimental.pallas import tpu as pltpu


# ---------------------------------------------------------------------------
# Kernel bodies
# ---------------------------------------------------------------------------

def _masked_per_sample(labels_ref, logits_ref, *, epsilon, num_classes,
                       batch_size, block_b):
    """(block_b, 1) f32 label-smoothed CE per row; rows past B are zeroed."""
    i = pl.program_id(0)
    x = logits_ref[...]                        # (block_b, C), native dtype
    labels = labels_ref[...]                   # (block_b, 1) int32

    # log-softmax pieces; the f32 cast / max-subtract are fused into the
    # exp+sum pass (no standalone "shifted" tile).
    m = jnp.max(x, axis=1, keepdims=True).astype(jnp.float32)          # (bb,1)
    lse = jnp.log(jnp.sum(jnp.exp(x.astype(jnp.float32) - m),
                          axis=1, keepdims=True))                      # (bb,1)

    # Single weighted reduction over raw logits:
    #   per_sample = m + lse - sum_c w_c * x_c,  w_c = eps/C + (1-eps)*[c==y]
    # (sum_c w_c == 1, so the m + lse terms factor out exactly.)
    off_w = epsilon / num_classes
    on_w = 1.0 - epsilon + off_w
    col = lax.broadcasted_iota(jnp.int32, x.shape, 1)                  # (bb,C)
    w = jnp.where(col == labels, on_w, off_w)                          # (bb,C)
    s = jnp.sum(w * x.astype(jnp.float32), axis=1, keepdims=True)      # (bb,1)

    per_sample = m + lse - s                                           # (bb,1)

    # Zero rows beyond the true batch size (last partial tile).
    row = i * block_b + lax.broadcasted_iota(jnp.int32, per_sample.shape, 0)
    return jnp.where(row < batch_size, per_sample, 0.0)


def _block_sum_kernel(labels_ref, logits_ref, partial_ref, *, epsilon,
                      num_classes, batch_size, block_b):
    """reduction=True: write one per-block partial sum (row 0 of an (8,1) block)."""
    masked = _masked_per_sample(labels_ref, logits_ref, epsilon=epsilon,
                                num_classes=num_classes,
                                batch_size=batch_size, block_b=block_b)
    psum = jnp.sum(masked, axis=0, keepdims=True)                      # (1,1)
    partial_ref[...] = jnp.broadcast_to(psum, (8, 1))


def _per_sample_kernel(labels_ref, logits_ref, loss_ref, *, epsilon,
                       num_classes, batch_size, block_b):
    """reduction=False: write per-sample losses for this batch tile."""
    loss_ref[...] = _masked_per_sample(labels_ref, logits_ref, epsilon=epsilon,
                                       num_classes=num_classes,
                                       batch_size=batch_size, block_b=block_b)


# ---------------------------------------------------------------------------
# Tile sizing / VMEM budgeting
# ---------------------------------------------------------------------------

_LANE_TILE_ROW_BYTES = 512     # one (rows,1) i32/f32 VMEM block costs 512 B/row


def _vmem_capacity_bytes():
    try:
        return int(pltpu.get_tpu_info().vmem_capacity_bytes)
    except Exception:
        return 64 * 1024 * 1024            # assume v7x (most restrictive)


def _row_vmem_bytes(num_classes, itemsize, reduction):
    """Approx. VMEM bytes per batch row of one grid step."""
    row = (2 * num_classes * itemsize          # logits block, double-buffered
           + 3 * num_classes * 4               # ~3 live f32 full-tile temporaries
           + 2 * _LANE_TILE_ROW_BYTES)         # labels (rows,1) block, 2 buffers
    if not reduction:
        row += 2 * _LANE_TILE_ROW_BYTES        # (rows,1) per-sample output block
    return row


def _auto_block_b(batch, row_bytes, vmem_cap):
    """Largest multiple-of-8 row tile that fits the per-generation VMEM budget."""
    budget = min(vmem_cap // 3, 40 * 1024 * 1024)
    if 8 * row_bytes > budget:
        # TODO(synk): class-axis tiling (online logsumexp) for vocab-scale C.
        raise ValueError(
            f"num_classes working set ({8 * row_bytes} B for 8 rows) exceeds "
            f"the VMEM budget ({budget} B); class-axis tiling not implemented.")
    rows = (budget // row_bytes) // 8 * 8
    # Keep >= 2 grid tiles when possible so both v7x TensorCores get work.
    if batch >= 16:
        half = (((batch + 1) // 2) + 7) // 8 * 8
        rows = min(rows, half)
    rows_padded = (batch + 7) // 8 * 8
    return int(max(8, min(rows, rows_padded)))


# ---------------------------------------------------------------------------
# Public wrapper
# ---------------------------------------------------------------------------

def cross_entropy_label_smooth(logits, labels, epsilon=0.1, reduction=True,
                               block_b=None):
    """logits: (B, C) float (f32 or bf16); labels: (B,) int.

    Returns scalar mean loss (reduction=True) or per-sample losses (B,).
    """
    B, C = logits.shape
    itemsize = jnp.dtype(logits.dtype).itemsize
    row_bytes = _row_vmem_bytes(C, itemsize, reduction)
    vmem_cap = _vmem_capacity_bytes()

    if block_b is None:
        block_b = _auto_block_b(B, row_bytes, vmem_cap)
    else:
        block_b = max(8, ((int(block_b) + 7) // 8) * 8)

    num_blocks = pl.cdiv(B, block_b)
    b_pad = num_blocks * block_b

    # Scoped-VMEM request sized to the chosen buffers (plus headroom), bounded
    # by the chip's physical per-core VMEM (64 MiB on v7x, 128 MiB v5e/v6e).
    footprint = block_b * row_bytes + 64 * 1024
    vmem_limit = int(min(max(footprint * 5 // 4, 32 * 1024 * 1024),
                         vmem_cap * 9 // 10))

    labels2d = labels.astype(jnp.int32).reshape(B, 1)
    kern_kw = dict(epsilon=float(epsilon), num_classes=float(C),
                   batch_size=B, block_b=block_b)

    in_specs = [
        pl.BlockSpec((block_b, 1), lambda i: (i, 0)),   # labels tile
        pl.BlockSpec((block_b, C), lambda i: (i, 0)),   # logits tile
    ]
    compiler_params = pltpu.CompilerParams(
        dimension_semantics=("parallel",),              # v7x: split tiles across TCs
        vmem_limit_bytes=vmem_limit,
    )
    out_bytes = (num_blocks * 8 * 4) if reduction else (b_pad * 4)
    cost = pl.CostEstimate(
        flops=7 * B * C,
        transcendentals=B * C + B,
        bytes_accessed=B * C * itemsize + B * 4 + out_bytes,
    )

    if reduction:
        partials = pl.pallas_call(
            functools.partial(_block_sum_kernel, **kern_kw),
            grid=(num_blocks,),
            out_shape=jax.ShapeDtypeStruct((num_blocks * 8, 1), jnp.float32),
            in_specs=in_specs,
            out_specs=pl.BlockSpec((8, 1), lambda i: (i, 0)),
            compiler_params=compiler_params,
            cost_estimate=cost,
        )(labels2d, logits)
        # Row 8*i holds block i's partial sum (rows are broadcast copies).
        return jnp.sum(partials[::8]) * (1.0 / B)

    per_sample = pl.pallas_call(
        functools.partial(_per_sample_kernel, **kern_kw),
        grid=(num_blocks,),
        out_shape=jax.ShapeDtypeStruct((b_pad, 1), jnp.float32),
        in_specs=in_specs,
        out_specs=pl.BlockSpec((block_b, 1), lambda i: (i, 0)),
        compiler_params=compiler_params,
        cost_estimate=cost,
    )(labels2d, logits)
    return per_sample[:B, 0]


# ---------------------------------------------------------------------------
# Pure-JAX reference + self-test
# ---------------------------------------------------------------------------

def _reference(logits, labels, epsilon=0.1, reduction=True):
    B, C = logits.shape
    x = logits.astype(jnp.float32)
    log_probs = jax.nn.log_softmax(x, axis=1)
    onehot = jax.nn.one_hot(labels, C, dtype=jnp.float32)
    targets = (1.0 - epsilon) * onehot + epsilon / C
    loss = jnp.sum(-targets * log_probs, axis=1)
    return jnp.mean(loss) if reduction else loss


if __name__ == "__main__":
    key = jax.random.PRNGKey(0)
    k1, k2 = jax.random.split(key)

    B, C = 12, 128        # batch not a multiple of 8 -> exercises row masking
    epsilon = 0.1

    logits = jax.random.normal(k1, (B, C), dtype=jnp.float32)
    labels = jax.random.randint(k2, (B,), 0, C, dtype=jnp.int32)

    ref = jax.block_until_ready(_reference(logits, labels, epsilon=epsilon))
    ref_ps = jax.block_until_ready(
        _reference(logits, labels, epsilon=epsilon, reduction=False))

    # Auto-tiled path (single block covering the whole padded batch).
    loss = jax.block_until_ready(
        cross_entropy_label_smooth(logits, labels, epsilon=epsilon))
    assert jnp.allclose(loss, ref, atol=1e-5, rtol=1e-5), (loss, ref)

    # Multi-block path with a partial last tile (masking + parallel grid).
    loss2 = jax.block_until_ready(
        cross_entropy_label_smooth(logits, labels, epsilon=epsilon, block_b=8))
    assert jnp.allclose(loss2, ref, atol=1e-5, rtol=1e-5), (loss2, ref)

    # Per-sample (reduction=False) path.
    ps = jax.block_until_ready(
        cross_entropy_label_smooth(logits, labels, epsilon=epsilon,
                                   reduction=False, block_b=8))
    assert jnp.allclose(ps, ref_ps, atol=1e-5, rtol=1e-5)

    print("KERNEL_OK")
</pallas_src>

<mosaic_0001>
module attributes {stable_mosaic.version = 11 : i64} {
  func.func @_block_sum_kernel(%arg0: i32, %arg1: memref<16x1xi32, #tpu.memory_space<vmem>>, %arg2: memref<16x128xf32, #tpu.memory_space<vmem>>, %arg3: memref<8x1xf32, #tpu.memory_space<vmem>>) attributes {dimension_semantics = [#tpu.dimension_semantics<parallel>], iteration_bounds = array<i64: 1>, scalar_prefetch = 0 : i64, scratch_operands = 0 : i64, tpu.core_type = #tpu.core_type<tc>, window_params = [{transform_indices = @transform_0, window_bounds = array<i64: 16, 1>}, {transform_indices = @transform_1, window_bounds = array<i64: 16, 128>}, {transform_indices = @transform_2, window_bounds = array<i64: 8, 1>}]} {
    %c0 = arith.constant 0 : index
    %c0_0 = arith.constant 0 : index
    %0 = vector.load %arg2[%c0, %c0_0] : memref<16x128xf32, #tpu.memory_space<vmem>>, vector<16x128xf32>
    %c0_1 = arith.constant 0 : index
    %c0_2 = arith.constant 0 : index
    %1 = vector.load %arg1[%c0_1, %c0_2] : memref<16x1xi32, #tpu.memory_space<vmem>>, vector<16x1xi32>
    %cst = arith.constant dense<0xFF800000> : vector<16xf32>
    %2 = vector.multi_reduction <maximumf>, %0, %cst [1] : vector<16x128xf32> to vector<16xf32>
    %3 = vector.shape_cast %2 : vector<16xf32> to vector<16x1xf32>
    %4 = vector.broadcast %3 : vector<16x1xf32> to vector<16x128xf32>
    %5 = arith.subf %0, %4 : vector<16x128xf32>
    %6 = math.exp %5 : vector<16x128xf32>
    %cst_3 = arith.constant dense<0.000000e+00> : vector<16xf32>
    %7 = vector.multi_reduction <add>, %6, %cst_3 [1] : vector<16x128xf32> to vector<16xf32>
    %8 = vector.shape_cast %7 : vector<16xf32> to vector<16x1xf32>
    %9 = math.log %8 : vector<16x1xf32>
    %10 = tpu.iota {dimensions = array<i32: 1>} : vector<16x128xi32>
    %11 = vector.broadcast %1 : vector<16x1xi32> to vector<16x128xi32>
    %12 = arith.cmpi eq, %10, %11 : vector<16x128xi32>
    %cst_4 = arith.constant 0.900781273 : f32
    %cst_5 = arith.constant 7.812500e-04 : f32
    %13 = vector.broadcast %cst_4 : f32 to vector<16x128xf32>
    %14 = vector.broadcast %cst_5 : f32 to vector<16x128xf32>
    %15 = arith.select %12, %13, %14 : vector<16x128xi1>, vector<16x128xf32>
    %16 = arith.mulf %15, %0 : vector<16x128xf32>
    %cst_6 = arith.constant dense<0.000000e+00> : vector<16xf32>
    %17 = vector.multi_reduction <add>, %16, %cst_6 [1] : vector<16x128xf32> to vector<16xf32>
    %18 = vector.shape_cast %17 : vector<16xf32> to vector<16x1xf32>
    %19 = arith.addf %3, %9 : vector<16x1xf32>
    %20 = arith.subf %19, %18 : vector<16x1xf32>
    %c16_i32 = arith.constant 16 : i32
    %21 = arith.muli %arg0, %c16_i32 : i32
    %22 = tpu.iota {dimensions = array<i32: 0>} : vector<16x1xi32>
    %23 = vector.broadcast %21 : i32 to vector<16x1xi32>
    %24 = arith.addi %23, %22 : vector<16x1xi32>
    %c12_i32 = arith.constant 12 : i32
    %25 = vector.broadcast %c12_i32 : i32 to vector<16x1xi32>
    %26 = arith.cmpi slt, %24, %25 : vector<16x1xi32>
    %cst_7 = arith.constant 0.000000e+00 : f32
    %27 = vector.broadcast %cst_7 : f32 to vector<16x1xf32>
    %28 = arith.select %26, %20, %27 : vector<16x1xi1>, vector<16x1xf32>
    %cst_8 = arith.constant dense<0.000000e+00> : vector<1xf32>
    %29 = vector.multi_reduction <add>, %28, %cst_8 [0] : vector<16x1xf32> to vector<1xf32>
    %30 = vector.shape_cast %29 : vector<1xf32> to vector<1x1xf32>
    %31 = vector.shape_cast %30 : vector<1x1xf32> to vector<1x1xf32>
    %32 = vector.broadcast %31 : vector<1x1xf32> to vector<8x1xf32>
    %c0_9 = arith.constant 0 : index
    %c0_10 = arith.constant 0 : index
    %33 = vector.load %arg3[%c0_9, %c0_10] : memref<8x1xf32, #tpu.memory_space<vmem>>, vector<8x1xf32>
    tpu.vector_store %arg3[%c0_9, %c0_10], %32 {strides = array<i32>} : memref<8x1xf32, #tpu.memory_space<vmem>>, vector<8x1xf32>,
    return
  }
  func.func @transform_0(%arg0: i32) -> (i32, i32) {
    %c0_i32 = arith.constant 0 : i32
    %c0_i32_0 = arith.constant 0 : i32
    return %arg0, %c0_i32 : i32, i32
  }
  func.func @transform_1(%arg0: i32) -> (i32, i32) {
    %c0_i32 = arith.constant 0 : i32
    %c0_i32_0 = arith.constant 0 : i32
    return %arg0, %c0_i32 : i32, i32
  }
  func.func @transform_2(%arg0: i32) -> (i32, i32) {
    %c0_i32 = arith.constant 0 : i32
    %c0_i32_0 = arith.constant 0 : i32
    return %arg0, %c0_i32 : i32, i32
  }
}

</mosaic_0001>

<bundles_post_ra>
// kernel: tpu_custom_call.1
= control target key start
LH: loop header
LB: loop body
LE: loop exit
PB: predicated region body
PF: predicated region fallthrough
CT: control target
= control target key end

     0   :  { %v91_v1 = vmov 0   ;;  %v33_v7 = vlaneseq  ;;  %v92_v15 = vmov 0.00078125   ;;  %vm73_vm3 = vcmask 7168   ;;  %s123_s1 = inlined_call_operand.vmem [shape: f32[12,128], index: 1, kind: input, shape index: {}]   ;;  %s124_s0 = inlined_call_operand.vmem [shape: s32[12,1], index: 0, kind: input, shape index: {}]   ;;  %s125_s2 = inlined_call_operand.vmem [shape: f32[8,1], index: 2, kind: output, shape index: {}]  }
   0x1   :  { %v12_v0 = vld [vmem:[%s123_s1 + $0x8] sm:$0xff]  ;;  %81 = vset.pattern.permute.xlu1 %v91_v1  ;;  %82 = vset.pattern.permute.xlu0 %v91_v1  ;;  %v11_v3 = vld [vmem:[%s123_s1] sm:$0xff] }
   0x2   :  { %v14_v2 = vld [vmem:[%s124_s0 + $0x8] sm:$0xff]  ;;  %17 = vmax.xlane.f32.xlu0 %v12_v0  ;;  %v13_v4 = vld [vmem:[%s124_s0] sm:$0xff]  ;;  %v34_v12 = vand.u32 127, %v33_v7  ;;  %v57_v24 = vshrl.u32 %v33_v7, 7 }
   0x3   :  { %39 = vperm.xlu1 %81, %v14_v2  }
   0x4   :  { %v58_v29 = vadd.s32 8, %v57_v24 }
   0x6   :  { %15 = vmax.xlane.f32.xlu0 %v11_v3  ;;  %vm63_vm2 = vcmp.lt.s32.totalorder %v58_v29, 12 }
   0x7   :  { %36 = vperm.xlu1 %81, %v13_v4  }
  0x82   :  { %v40_v11 = vpop.permute.xlu1 %39 }
  0x83   :  { %vm42_vm0 = vcmp.eq.s32.totalorder %v34_v12, %v40_v11 }
  0x84   :  { %v44_v16 = vsel %vm42_vm0, 0.9007813, %v92_v15 }
  0x85   :  { %v46_v18 = vmul.f32 %v44_v16, %v12_v0 }
  0x86   :  { %v37_v14 = vpop.permute.xlu1 %36 }
  0x87   :  { %vm41_vm1 = vcmp.eq.s32.totalorder %v34_v12, %v37_v14 }
  0x88   :  { %v43_v19 = vsel %vm41_vm1, 0.9007813, %v92_v15 }
  0x89   :  { %v45_v21 = vmul.f32 %v43_v19, %v11_v3 }
  0x8f   :  { %v18_v5 = vpop.xlane.xlu0 %17 }
  0x90   :  { %v20_v6 = vsub.f32 %v12_v0, %v18_v5 }
  0x92   :  { %v23_v8 = vmul.f32 1.442695, %v20_v6 }
  0x93   :  { %v16_v9 = vpop.xlane.xlu0 %15 }
  0x94   :  { %83 = vpow2.f32 %v23_v8  ;;  %v19_v10 = vsub.f32 %v11_v3, %v16_v9 }
  0x96   :  { %v21_v13 = vmul.f32 1.442695, %v19_v10 }
  0x98   :  { %85 = vpow2.f32 %v21_v13 }
  0x9e   :  { %v84_v17 = vpop.eup %83 }
  0x9f   :  { %27 = vadd.xlane.f32.xlu0 %v84_v17 }
  0xa2   :  { %v86_v20 = vpop.eup %85 }
  0xa3   :  { %25 = vadd.xlane.f32.xlu1 %v86_v20  ;;  %49 = vadd.xlane.f32.xlu0 %v46_v18 }
  0xa7   :  { %47 = vadd.xlane.f32.xlu0 %v45_v21 }
 0x12c   :  { %v28_v22 = vpop.xlane.xlu0 %27 }
 0x12d   :  { %87 = vlog2.f32 %v28_v22 }
 0x130   :  { %v26_v23 = vpop.xlane.xlu1 %25  ;;  %v50_v27 = vpop.xlane.xlu0 %49 }
 0x131   :  { %89 = vlog2.f32 %v26_v23 }
 0x134   :  { %v48_v34 = vpop.xlane.xlu0 %47 }
 0x137   :  { %v88_v25 = vpop.eup %87 }
 0x138   :  { %v32_v26 = vmul.f32 0.6931472, %v88_v25 }
 0x13a   :  { %v52_v28 = vadd.f32 %v32_v26, %v18_v5 }
 0x13b   :  { %v90_v30 = vpop.eup %89 }
 0x13c   :  { %v30_v31 = vmul.f32 0.6931472, %v90_v30  ;;  %v54_v32 = vsub.f32 %v52_v28, %v50_v27 }
 0x13e   :  { %v51_v33 = vadd.f32 %v30_v31, %v16_v9  ;;  %v65_v36 = vsel %vm63_vm2, %v54_v32, 0.0 }
 0x140   :  { %v53_v35 = vsub.f32 %v51_v33, %v48_v34 }
 0x142   :  { %v66_v37 = vadd.f32 %v65_v36, %v53_v35 }
 0x144   :  { %v67_v38 = vrot.slane %v66_v37, 4 }
 0x146   :  { %v68_v39 = vadd.f32 %v67_v38, %v66_v37 }
 0x148   :  { %v69_v40 = vrot.slane %v68_v39, 2 }
 0x14a   :  { %v70_v41 = vadd.f32 %v69_v40, %v68_v39 }
 0x14c   :  { %v71_v42 = vrot.slane %v70_v41, 1 }
 0x14e   :  { %v72_v43 = vadd.f32 %v71_v42, %v70_v41 }
 0x150   :  { %74 = vst.msk [vmem:[%s125_s2] sm:$0xff] %vm73_vm3, %v72_v43 }

</bundles_post_ra>
